<compile_context>
chip_gen: v7x
topology: tpu7x:2x2x1
jax: 0.10.0
libtpu: 0.0.40
codegen_flags: <defaults>
</compile_context>

<pallas_src>
import functools
import math

import jax
import jax.numpy as jnp
from jax.experimental import pallas as pl
from jax.experimental.pallas import tpu as pltpu


def _cdiv(a, b):
    return (a + b - 1) // b


def _round_up(a, b):
    return _cdiv(a, b) * b


def _jodie_kernel(h_ref, tsm_ref, wb_ref, o_ref, *, rep):
    """One (tm, tn) tile.

    h_ref:   (tm, tn)     native dtype (f32 / bf16 / ...)
    tsm_ref: (tm, 2R)     f32; cols [0:R] = ts, [R:2R] = mem_ts (packed rows)
    wb_ref:  (R+1, tn)    f32; rows 0..R-1 = selector weights, row R = 1+bias
    o_ref:   (tm, tn)     same dtype as h
    """
    R = rep
    ts = tsm_ref[:, 0:R]
    mem = tsm_ref[:, R:2 * R]
    # time_diff = (ts - mem_ts) / (ts + 1); reciprocal runs on the EUP slot.
    td = (ts - mem) * pl.reciprocal(ts + 1.0, approx=False)        # (tm, R) f32

    w_sel = wb_ref[0:R, :]                                          # (R, tn)
    b1 = wb_ref[R:R + 1, :]                                         # (1, tn) = 1 + bias
    if R == 1:
        emb = td * w_sel + b1                                       # broadcast fma
    else:
        # Broadcast each per-row scalar over its D-lane group on the idle MXU.
        emb = jnp.dot(td, w_sel, preferred_element_type=jnp.float32) + b1

    # Multiply in h's native dtype (avoids a full-tile upconvert for bf16 h).
    o_ref[...] = (h_ref[...] * emb.astype(o_ref.dtype)).astype(o_ref.dtype)


def jodie_time_embedding(h, mem_ts, ts, weight, bias, *,
                         tile_bytes=2 * 1024 * 1024, vmem_limit_bytes=None):
    """h: [N, D] (any float dtype), mem_ts/ts: [N], weight: [D, 1] (torch), bias: [D].

    Returns [N, D] in h.dtype.
    """
    N, D = h.shape
    out_dtype = h.dtype
    itemsize = jnp.dtype(out_dtype).itemsize
    f32 = jnp.float32

    w_row = jnp.asarray(weight, f32).reshape(1, D)         # Linear(1, D).weight^T
    b1_row = 1.0 + jnp.asarray(bias, f32).reshape(1, D)    # fold the "+1" into bias

    # Lane packing: pack R original rows per super-row so R*D is a multiple of 128.
    R = 128 // math.gcd(D, 128) if D % 128 != 0 else 1
    if R > 1 and N % R != 0:
        R = 1          # avoid a full padding copy of h; stores get lane-masked
    Dp = R * D
    M = N // R

    # Merged (R+1, Dp) weight/bias side input: W2[r, l] = w[l % D] iff l//D == r.
    if R > 1:
        eye = jnp.eye(R, dtype=f32)
        w_sel = (eye[:, :, None] * w_row.reshape(1, 1, D)).reshape(R, Dp)
        b1_full = jnp.tile(b1_row, (1, R))
    else:
        w_sel, b1_full = w_row, b1_row
    wb = jnp.concatenate([w_sel, b1_full], axis=0)          # (R+1, Dp) f32

    # ts / mem_ts merged side stream, (M, 2R) f32 (O(N) only).
    ts_f = jnp.asarray(ts, f32).reshape(M, R)
    mem_f = jnp.asarray(mem_ts, f32).reshape(M, R)
    tsm = jnp.concatenate([ts_f, mem_f], axis=1)

    h2 = h.reshape(M, Dp)        # row-major repack, metadata only (N*D == M*Dp)

    # ---- tile sizing (per-buffer byte budget) ------------------------------
    sub = {1: 32, 2: 16}.get(itemsize, 8)     # sublane packing of h's dtype
    # Columns: prefer full width; tile columns only if even `sub` rows blow the budget.
    if Dp % 128 == 0 and Dp * itemsize * sub > tile_bytes:
        tn_eff = 128
        t = Dp
        while t >= 128:
            if Dp % t == 0 and t * itemsize * sub <= tile_bytes:
                tn_eff = t
                break
            t -= 128
    else:
        tn_eff = Dp

    tm_cap = max(sub, (tile_bytes // (tn_eff * itemsize)) // sub * sub)
    tm_eff = min(tm_cap, 4096)
    if tm_eff >= M:
        if M > sub:
            # keep >= 2 row steps so the "parallel" row axis can shard on v7x
            split = _round_up(_cdiv(M, 2), sub)
            tm_eff = split if split < M else M
        else:
            tm_eff = M           # full-extent rows: always a legal block

    grid = (_cdiv(M, tm_eff), _cdiv(Dp, tn_eff))
    kernel = functools.partial(_jodie_kernel, rep=R)

    out = pl.pallas_call(
        kernel,
        out_shape=jax.ShapeDtypeStruct((M, Dp), out_dtype),
        grid_spec=pltpu.PrefetchScalarGridSpec(
            num_scalar_prefetch=0,
            grid=grid,
            in_specs=[
                pl.BlockSpec((tm_eff, tn_eff), lambda i, j: (i, j)),   # h tile
                pl.BlockSpec((tm_eff, 2 * R), lambda i, j: (i, 0)),    # [ts | mem_ts]
                pl.BlockSpec((R + 1, tn_eff), lambda i, j: (0, j)),    # [w_sel; 1+bias]
            ],
            out_specs=pl.BlockSpec((tm_eff, tn_eff), lambda i, j: (i, j)),
        ),
        compiler_params=pltpu.CompilerParams(
            dimension_semantics=("parallel", "parallel"),
            vmem_limit_bytes=vmem_limit_bytes,
        ),
    )(h2, tsm, wb)

    return out.reshape(N, D)


def reference(h, mem_ts, ts, weight, bias):
    time_diff = (ts - mem_ts) / (ts + 1.0)                           # [N]
    emb = time_diff[:, None] * weight.reshape(1, -1) + bias[None, :]
    return h * (1.0 + emb)


if __name__ == "__main__":
    key = jax.random.PRNGKey(0)

    # --- Case 1: small D (< 128) -> lane-packed MXU-selector path (R = 4) ----
    N, dim_out = 16, 32
    k_h, k_mem, k_ts, k_w, k_b = jax.random.split(key, 5)
    h = jax.random.normal(k_h, (N, dim_out), dtype=jnp.float32)
    mem_ts = jax.random.uniform(k_mem, (N,), dtype=jnp.float32, minval=0.0, maxval=5.0)
    ts = mem_ts + jax.random.uniform(k_ts, (N,), dtype=jnp.float32, minval=0.0, maxval=5.0)

    # NormalLinear(1, dim_out): weight [dim_out, 1], bias [dim_out], stdv = 1
    stdv = 1.0 / math.sqrt(1.0)
    weight = stdv * jax.random.normal(k_w, (dim_out, 1), dtype=jnp.float32)
    bias = stdv * jax.random.normal(k_b, (dim_out,), dtype=jnp.float32)

    out = jax.block_until_ready(jodie_time_embedding(h, mem_ts, ts, weight, bias))
    expected = reference(h, mem_ts, ts, weight, bias)
    assert out.shape == (N, dim_out) and out.dtype == jnp.float32
    assert jnp.allclose(out, expected, atol=1e-5, rtol=1e-5), "f32 packed path mismatch"

    # --- Case 1b: same shapes, native bf16 I/O (dtype-preserving path) -------
    h_bf = h.astype(jnp.bfloat16)
    out_bf = jax.block_until_ready(jodie_time_embedding(h_bf, mem_ts, ts, weight, bias))
    exp_bf = reference(h_bf.astype(jnp.float32), mem_ts, ts, weight, bias)
    assert out_bf.dtype == jnp.bfloat16
    assert jnp.allclose(out_bf.astype(jnp.float32), exp_bf, atol=2e-2, rtol=2e-2), \
        "bf16 path mismatch"

    # --- Case 2: D multiple of 128, ragged N -> OOB tail rows, no pad/slice --
    N2, D2 = 40, 256
    k2 = jax.random.split(jax.random.PRNGKey(1), 5)
    h2 = jax.random.normal(k2[0], (N2, D2), dtype=jnp.float32)
    mem2 = jax.random.uniform(k2[1], (N2,), dtype=jnp.float32, minval=0.0, maxval=5.0)
    ts2 = mem2 + jax.random.uniform(k2[2], (N2,), dtype=jnp.float32, minval=0.0, maxval=5.0)
    w2 = jax.random.normal(k2[3], (D2, 1), dtype=jnp.float32)
    b2 = jax.random.normal(k2[4], (D2,), dtype=jnp.float32)
    out2 = jax.block_until_ready(
        jodie_time_embedding(h2, mem2, ts2, w2, b2, tile_bytes=16 * 1024))  # 3 row tiles
    assert out2.shape == (N2, D2)
    assert jnp.allclose(out2, reference(h2, mem2, ts2, w2, b2), atol=1e-5, rtol=1e-5), \
        "ragged-N path mismatch"

    # --- Case 3: D = 96 (does not divide 128) -> generalized packing, Dp=384 -
    N3, D3 = 24, 96
    k3 = jax.random.split(jax.random.PRNGKey(2), 5)
    h3 = jax.random.normal(k3[0], (N3, D3), dtype=jnp.float32)
    mem3 = jax.random.uniform(k3[1], (N3,), dtype=jnp.float32, minval=0.0, maxval=5.0)
    ts3 = mem3 + jax.random.uniform(k3[2], (N3,), dtype=jnp.float32, minval=0.0, maxval=5.0)
    w3 = jax.random.normal(k3[3], (D3, 1), dtype=jnp.float32)
    b3 = jax.random.normal(k3[4], (D3,), dtype=jnp.float32)
    out3 = jax.block_until_ready(jodie_time_embedding(h3, mem3, ts3, w3, b3))
    assert jnp.allclose(out3, reference(h3, mem3, ts3, w3, b3), atol=1e-5, rtol=1e-5), \
        "D=96 packed path mismatch"

    # --- Case 4: N not a multiple of the packing factor -> R=1 fallback ------
    N4, D4 = 7, 100
    k4 = jax.random.split(jax.random.PRNGKey(3), 5)
    h4 = jax.random.normal(k4[0], (N4, D4), dtype=jnp.float32)
    mem4 = jax.random.uniform(k4[1], (N4,), dtype=jnp.float32, minval=0.0, maxval=5.0)
    ts4 = mem4 + jax.random.uniform(k4[2], (N4,), dtype=jnp.float32, minval=0.0, maxval=5.0)
    w4 = jax.random.normal(k4[3], (D4, 1), dtype=jnp.float32)
    b4 = jax.random.normal(k4[4], (D4,), dtype=jnp.float32)
    out4 = jax.block_until_ready(jodie_time_embedding(h4, mem4, ts4, w4, b4))
    assert jnp.allclose(out4, reference(h4, mem4, ts4, w4, b4), atol=1e-5, rtol=1e-5), \
        "R=1 fallback path mismatch"

    # --- Case 5: wide D with tiny budget -> column-tiled 2-D grid ------------
    N5, D5 = 24, 512
    k5 = jax.random.split(jax.random.PRNGKey(4), 5)
    h5 = jax.random.normal(k5[0], (N5, D5), dtype=jnp.float32)
    mem5 = jax.random.uniform(k5[1], (N5,), dtype=jnp.float32, minval=0.0, maxval=5.0)
    ts5 = mem5 + jax.random.uniform(k5[2], (N5,), dtype=jnp.float32, minval=0.0, maxval=5.0)
    w5 = jax.random.normal(k5[3], (D5, 1), dtype=jnp.float32)
    b5 = jax.random.normal(k5[4], (D5,), dtype=jnp.float32)
    out5 = jax.block_until_ready(
        jodie_time_embedding(h5, mem5, ts5, w5, b5, tile_bytes=8 * 1024))   # (3, 2) grid
    assert jnp.allclose(out5, reference(h5, mem5, ts5, w5, b5), atol=1e-5, rtol=1e-5), \
        "column-tiled path mismatch"

    print("KERNEL_OK")
</pallas_src>

<mosaic_0001>
module attributes {stable_mosaic.version = 11 : i64} {
  func.func @_jodie_kernel(%arg0: i32, %arg1: i32, %arg2: memref<4x128xf32, #tpu.memory_space<vmem>>, %arg3: memref<4x8xf32, #tpu.memory_space<vmem>>, %arg4: memref<5x128xf32, #tpu.memory_space<vmem>>, %arg5: memref<4x128xf32, #tpu.memory_space<vmem>>) attributes {dimension_semantics = [#tpu.dimension_semantics<parallel>, #tpu.dimension_semantics<parallel>], iteration_bounds = array<i64: 1, 1>, scalar_prefetch = 0 : i64, scratch_operands = 0 : i64, tpu.core_type = #tpu.core_type<tc>, window_params = [{transform_indices = @transform_0, window_bounds = array<i64: 4, 128>}, {transform_indices = @transform_1, window_bounds = array<i64: 4, 8>}, {transform_indices = @transform_2, window_bounds = array<i64: 5, 128>}, {transform_indices = @transform_3, window_bounds = array<i64: 4, 128>}]} {
    %c0 = arith.constant 0 : index
    %c0_0 = arith.constant 0 : index
    %0 = vector.load %arg3[%c0, %c0_0] : memref<4x8xf32, #tpu.memory_space<vmem>>, vector<4x4xf32>
    %c0_1 = arith.constant 0 : index
    %c4 = arith.constant 4 : index
    %1 = vector.load %arg3[%c0_1, %c4] : memref<4x8xf32, #tpu.memory_space<vmem>>, vector<4x4xf32>
    %2 = arith.subf %0, %1 : vector<4x4xf32>
    %cst = arith.constant 1.000000e+00 : f32
    %3 = vector.broadcast %cst : f32 to vector<4x4xf32>
    %4 = arith.addf %0, %3 : vector<4x4xf32>
    %5 = tpu.reciprocal %4 : vector<4x4xf32> -> vector<4x4xf32>
    %6 = arith.mulf %2, %5 : vector<4x4xf32>
    %c0_2 = arith.constant 0 : index
    %c0_3 = arith.constant 0 : index
    %7 = vector.load %arg4[%c0_2, %c0_3] : memref<5x128xf32, #tpu.memory_space<vmem>>, vector<4x128xf32>
    %c4_4 = arith.constant 4 : index
    %c0_5 = arith.constant 0 : index
    %8 = vector.load %arg4[%c4_4, %c0_5] : memref<5x128xf32, #tpu.memory_space<vmem>>, vector<1x128xf32>
    %cst_6 = arith.constant dense<0.000000e+00> : vector<4x128xf32>
    %9 = tpu.matmul %6, %7, %cst_6 {dimension_numbers = #tpu.dot_dimension_numbers<[1], [0], [0], [1], [0, 0, 1, 1], [], []>} : vector<4x4xf32>, vector<4x128xf32>, vector<4x128xf32> -> vector<4x128xf32>
    %10 = vector.broadcast %8 : vector<1x128xf32> to vector<4x128xf32>
    %11 = arith.addf %9, %10 : vector<4x128xf32>
    %c0_7 = arith.constant 0 : index
    %c0_8 = arith.constant 0 : index
    %12 = vector.load %arg2[%c0_7, %c0_8] : memref<4x128xf32, #tpu.memory_space<vmem>>, vector<4x128xf32>
    %13 = arith.mulf %12, %11 : vector<4x128xf32>
    %c0_9 = arith.constant 0 : index
    %c0_10 = arith.constant 0 : index
    %14 = vector.load %arg5[%c0_9, %c0_10] : memref<4x128xf32, #tpu.memory_space<vmem>>, vector<4x128xf32>
    tpu.vector_store %arg5[%c0_9, %c0_10], %13 {strides = array<i32>} : memref<4x128xf32, #tpu.memory_space<vmem>>, vector<4x128xf32>,
    return
  }
  func.func @transform_0(%arg0: i32, %arg1: i32) -> (i32, i32) {
    %c0_i32 = arith.constant 0 : i32
    return %arg0, %arg1 : i32, i32
  }
  func.func @transform_1(%arg0: i32, %arg1: i32) -> (i32, i32) {
    %c0_i32 = arith.constant 0 : i32
    %c0_i32_0 = arith.constant 0 : i32
    return %arg0, %c0_i32 : i32, i32
  }
  func.func @transform_2(%arg0: i32, %arg1: i32) -> (i32, i32) {
    %c0_i32 = arith.constant 0 : i32
    %c0_i32_0 = arith.constant 0 : i32
    return %c0_i32, %arg1 : i32, i32
  }
  func.func @transform_3(%arg0: i32, %arg1: i32) -> (i32, i32) {
    %c0_i32 = arith.constant 0 : i32
    return %arg0, %arg1 : i32, i32
  }
}

</mosaic_0001>

<bundles_post_ra>
// kernel: tpu_custom_call.1
= control target key start
LH: loop header
LB: loop body
LE: loop exit
PB: predicated region body
PF: predicated region fallthrough
CT: control target
= control target key end

     0   :  { %8 = vsyncpa [#allocation3], 0  ;;  %s350_s0 = inlined_call_operand.hbm [shape: f32[4,128], index: 0, kind: input, shape index: {}]   ;;  %s351_s1 = inlined_call_operand.hbm [shape: f32[4,8], index: 1, kind: input, shape index: {}]   ;;  %s352_s2 = inlined_call_operand.hbm [shape: f32[5,128], index: 2, kind: input, shape index: {}]   ;;  %s353_s3 = inlined_call_operand.hbm [shape: f32[4,128], index: 3, kind: output, shape index: {}]  }
   0x1   :  { %9 = vsyncpa [#allocation6], 0 }
   0x2   :  { %10 = vsyncpa [#allocation4], 0  ;;  %s275_s12 = smov [#allocation5]   ;;  %s276_s14 = smov [#allocation2]  }
   0x3   :  { %s27_s13 = sshll.u32 %s275_s12, 4  ;;  %s17_s15 = sshll.u32 %s276_s14, 4  ;;  %s28_s13 = int_to_ptr.vmem [resolvable:$true] %s27_s13  ;;  %s18_s15 = int_to_ptr.vmem [resolvable:$true] %s17_s15 }
   0x4   :  { %s181_s18 = scalar_lea.hbm %s351_s1, 64 }
   0x5   :  { %p182_p0 = scmp.ne.s32.totalorder %s351_s1, %s181_s18  ;;  %p185_p1 = scmp.lt.u32.totalorder %s181_s18, %s351_s1 }
   0x7   :  { %p187_p2 = pnand %p185_p1, %p182_p0 }
   0x9   :  { %190 = shalt.err (!%p187_p2)
}
   0xa   :  { %s191_s23 = scalar_lea.vmem %s28_s13, 64  ;;  %p196_p4 = scmp.lt.s32.totalorder %s28_s13, %s28_s13 }
   0xb   :  { %p192_p3 = scmp.ne.s32.totalorder %s28_s13, %s191_s23  ;;  %p197_p5 = scmp.lt.s32.totalorder %s191_s23, %s191_s23 }
   0xd   :  { %p198_p6 = por %p197_p5, %p196_p4 }
   0xf   :  { %p199_p7 = pnand %p198_p6, %p192_p3 }
  0x11   :  { %202 = shalt.err (!%p199_p7)
}
  0x12   :  { %30 = dma.hbm_to_vmem [thread:$0]  %s351_s1, 64, %s28_s13, [#allocation6]  }
  0x13   :  { %s203_s28 = scalar_lea.hbm %s350_s0, 64 }
  0x14   :  { %p204_p8 = scmp.ne.s32.totalorder %s350_s0, %s203_s28  ;;  %p207_p9 = scmp.lt.u32.totalorder %s203_s28, %s350_s0 }
  0x16   :  { %p209_p10 = pnand %p207_p9, %p204_p8 }
  0x18   :  { %212 = shalt.err (!%p209_p10)
}
  0x19   :  { %s213_s6 = scalar_lea.vmem %s18_s15, 64  ;;  %p218_p12 = scmp.lt.s32.totalorder %s18_s15, %s18_s15 }
  0x1a   :  { %p214_p11 = scmp.ne.s32.totalorder %s18_s15, %s213_s6  ;;  %p219_p13 = scmp.lt.s32.totalorder %s213_s6, %s213_s6 }
  0x1c   :  { %p220_p0 = por %p219_p13, %p218_p12 }
  0x1e   :  { %p221_p1 = pnand %p220_p0, %p214_p11 }
  0x20   :  { %224 = shalt.err (!%p221_p1)
}
  0x21   :  { %20 = dma.hbm_to_vmem [thread:$0]  %s350_s0, 64, %s18_s15, [#allocation3]  }
  0x22   :  { %s277_s8 = smov [#allocation7]   ;;  %s225_s12 = scalar_lea.hbm %s352_s2, 128 }
  0x23   :  { %s37_s9 = sshll.u32 %s277_s8, 4  ;;  %p226_p2 = scmp.ne.s32.totalorder %s352_s2, %s225_s12  ;;  %s38_s9 = int_to_ptr.vmem [resolvable:$true] %s37_s9 }
  0x24   :  { %p229_p3 = scmp.lt.u32.totalorder %s225_s12, %s352_s2 }
  0x26   :  { %p231_p4 = pnand %p229_p3, %p226_p2 }
  0x28   :  { %234 = shalt.err (!%p231_p4)
}
  0x29   :  { %s235_s18 = scalar_lea.vmem %s38_s9, 128  ;;  %p240_p6 = scmp.lt.s32.totalorder %s38_s9, %s38_s9 }
  0x2a   :  { %p236_p5 = scmp.ne.s32.totalorder %s38_s9, %s235_s18  ;;  %p241_p7 = scmp.lt.s32.totalorder %s235_s18, %s235_s18 }
  0x2c   :  { %p242_p8 = por %p241_p7, %p240_p6 }
  0x2e   :  { %p243_p9 = pnand %p242_p8, %p236_p5 }
  0x30   :  { %246 = shalt.err (!%p243_p9)
}
  0x31   :  { %40 = dma.hbm_to_vmem [thread:$0]  %s352_s2, 128, %s38_s9, [#allocation6]  }
  0x32   :  { %269 = dma.done.wait [#allocation3], 64  }
  0x33   :  { %270 = vsyncadd [#allocation3], 4294967232 }
  0x34   :  { %271 = dma.done.wait [#allocation6], 192  }
  0x35   :  { %272 = vsyncadd [#allocation6], 4294967104  ;;  %v278_v0 = vmov 0.0   ;;  %vm279_vm0 = vmmov 0   ;;  %vm69_vm1 = vcmask 1043456   ;;  %s280_s19 = smov 124  }
  0x36   :  { %167 = vmatprep.subr.mxu0 %v278_v0  ;;  %169 = vmatprep.mubr.msk.f32.mxu0 %vm279_vm0, %v278_v0  ;;  %v50_v1 = vld [vmem:[#allocation5] sm:$0xf]  ;;  %v59_v2 = vld [vmem:[#allocation7] sm:$0xf]  ;;  %vm65_vm2 = vcmask 31744   ;;  %s281_s2 = smov [#allocation8]  }
  0x37   :  { %52 = vrot.lane.b32.xlu0 %v50_v1, %s280_s19  ;;  %168 = vmatpush3.msk.msra.mxu0 %vm69_vm1, %v59_v2  ;;  %v56_v3 = vadd.f32 1.0, %v50_v1  ;;  %v162_v8 = vld [vmem:[#allocation7 + $0x4] ss:$0 sm:$0xff]  ;;  %v143_v10 = vld [vmem:[#allocation2] sm:$0xf]  ;;  %s152_s20 = sshll.u32 %s281_s2, 4  ;;  %s153_s20 = int_to_ptr.vmem [resolvable:$true] %s152_s20 }
  0x38   :  { %s247_s21 = scalar_lea.vmem %s153_s20, 64  ;;  %p252_p11 = scmp.lt.s32.totalorder %s153_s20, %s153_s20 }
  0x39   :  { %179 = vrcp.f32 %v56_v3  ;;  %p248_p10 = scmp.ne.s32.totalorder %s153_s20, %s247_s21  ;;  %p253_p12 = scmp.lt.s32.totalorder %s247_s21, %s247_s21 }
  0x3b   :  { %p254_p13 = por %p253_p12, %p252_p11 }
  0x3d   :  { %p255_p0 = pnand %p254_p13, %p248_p10 }
  0x43   :  { %v180_v4 = vpop.eup %179 }
  0xa9   :  { %v53_v5 = vpop.permute.xlu0 %52 }
  0xaa   :  { %v55_v6 = vsub.f32 %v50_v1, %v53_v5 }
  0xac   :  { %v58_v7 = vmul.f32 %v180_v4, %v55_v6 }
  0xae   :  { %170 = vmatmul.mubr.msk.f32.vlgmr.msra.gmra.mrb[0].mxu0 %vm65_vm2, %v58_v7 }
 0x181   :  { %v139_v9 = vpop.f32.mrb[0].mxu0 }
 0x182   :  { %v140_v11 = vadd.f32 %v162_v8, %v139_v9  ;;  %v171_v12 = vpop.f32.mrb[1].mxu0 }
 0x184   :  { %v144_v13 = vmul.f32 %v143_v10, %v140_v11 }
 0x186   :  { %145 = vst [vmem:[#allocation8] sm:$0xf] %v144_v13 }
 0x187   :  { %258 = shalt.err (!%p255_p0)
}
 0x188   :  { %s259_s24 = scalar_lea.hbm %s353_s3, 64 }
 0x189   :  { %p260_p1 = scmp.ne.s32.totalorder %s353_s3, %s259_s24  ;;  %p263_p2 = scmp.lt.u32.totalorder %s259_s24, %s353_s3 }
 0x18b   :  { %p265_p3 = pnand %p263_p2, %p260_p1 }
 0x18d   :  { %268 = shalt.err (!%p265_p3)
}
 0x18e   :  { %155 = dma.vmem_to_hbm [thread:$0]  %s153_s20, 64, %s353_s3, [#allocation4]  }
 0x18f   :  { %273 = dma.done.wait [#allocation4], 64  }
 0x190   :  { %274 = vsyncadd [#allocation4], 4294967232 }
 0x191   :  { %159 = vsyncpa [#allocation3], 1 }
 0x192   :  { %160 = vsyncpa [#allocation6], 1 }
 0x193   :  { %161 = vsyncpa [#allocation4], 1 }

</bundles_post_ra>
